<compile_context>
chip_gen: v6e
topology: v6e:2x2x1
jax: 0.10.0
libtpu: 0.0.40
codegen_flags: <defaults>
</compile_context>

<pallas_src>
import jax
import jax.numpy as jnp
from jax import lax
from jax.experimental import pallas as pl
from jax.experimental.pallas import tpu as pltpu


def bio_ner_kernel(x_ref, mask_ref, w_ref, b_ref, o_ref):
    # x_ref:    (tile_n, E)  flattened rep_word rows, native dtype (f32 or bf16)
    # mask_ref: (1, tile_n)  attention mask, f32
    # w_ref:    (C, E)       linear1 weight in native PyTorch layout
    # b_ref:    (C, 1)       linear1 bias, f32
    # o_ref:    (C, tile_n)  masked logits, lane-dense along N
    logits = lax.dot_general(
        w_ref[...], x_ref[...],
        dimension_numbers=(((1,), (1,)), ((), ())),   # contract E with E -> (C, tile_n)
        preferred_element_type=jnp.float32,
    )
    # Bias broadcasts over lanes, mask broadcasts over sublanes — pure VPU, f32.
    o_ref[...] = ((logits + b_ref[...]) * mask_ref[...]).astype(o_ref.dtype)


def bio_ner_forward(rep_word, attention_mask, weight, bias, *, tile_n=2048):
    """rep_word: (B, S, E); attention_mask: (B, S); weight: (C, E) (PyTorch
    nn.Linear layout); bias: (C,).  Returns mask_logits: (B, C, S) f32."""
    B, S, E = rep_word.shape
    C = weight.shape[0]
    N = B * S

    # Flatten batch (no-copy reshape); keep rep_word's native dtype — no extra
    # HBM pass for a cast on this bandwidth-bound kernel.
    x = rep_word.reshape(N, E)                                # (N, E)
    w = weight.astype(x.dtype)                                # (C, E) tiny
    b = bias.reshape(C, 1).astype(jnp.float32)                # (C, 1) tiny
    mask = attention_mask.reshape(1, N).astype(jnp.float32)   # (1, N)

    # Tile the flattened N axis.  When tiling, tile_n must be a multiple of 128
    # (it is the lane dim of the mask/output blocks); when N fits in one tile
    # we use full-array blocks (always legal).  Ragged tails are handled by the
    # cdiv grid: Pallas pads boundary-block reads and drops out-of-bounds
    # writes, so no monolithic fallback and no host-side padding pass.
    if tile_n >= N:
        tile_n = N
    else:
        tile_n = max(128, (int(tile_n) // 128) * 128)
    grid = (pl.cdiv(N, tile_n),)

    # Explicit VMEM budget: double-buffered x tile dominates; add sublane-padded
    # output/mask buffers, the weight block, and slack.  (v5e's scoped default
    # is only 16 MiB, so be explicit.)
    itemsize = jnp.dtype(x.dtype).itemsize
    vmem_need = (2 * tile_n * E * itemsize          # x tiles (double-buffered)
                 + 2 * 8 * tile_n * 4               # (C->8, tile_n) f32 out tiles
                 + 2 * 8 * tile_n * 4               # (1->8, tile_n) f32 mask tiles
                 + 2 * 8 * max(E, 128) * itemsize   # weight block
                 + (4 << 20))                       # bias + compiler scratch slack
    vmem_limit = int(max(vmem_need, 32 * 1024 * 1024))

    out = pl.pallas_call(
        bio_ner_kernel,
        out_shape=jax.ShapeDtypeStruct((C, N), jnp.float32),
        grid_spec=pltpu.PrefetchScalarGridSpec(
            num_scalar_prefetch=0,
            grid=grid,
            in_specs=[
                pl.BlockSpec((tile_n, E), lambda i: (i, 0)),  # rep_word rows
                pl.BlockSpec((1, tile_n), lambda i: (0, i)),  # attention mask
                pl.BlockSpec((C, E), lambda i: (0, 0)),       # weight (grid-invariant)
                pl.BlockSpec((C, 1), lambda i: (0, 0)),       # bias   (grid-invariant)
            ],
            out_specs=pl.BlockSpec((C, tile_n), lambda i: (0, i)),
        ),
        compiler_params=pltpu.CompilerParams(
            dimension_semantics=("parallel",),   # independent row tiles -> dual-TC on v7x
            vmem_limit_bytes=vmem_limit,
        ),
    )(x, mask, w, b)

    # (C, B*S) -> (B, C, S): cheap wrapper-side layout plumbing (output bytes
    # are ~1% of input bytes); matches permute(0, 2, 1) in the PyTorch forward.
    return out.reshape(C, B, S).transpose(1, 0, 2)


def reference_forward(rep_word, attention_mask, weight, bias):
    """Pure-JAX f32 reference mirroring the PyTorch forward."""
    logits = jnp.einsum("bse,ce->bsc", rep_word, weight,
                        preferred_element_type=jnp.float32) + bias   # (B, S, C)
    logits = jnp.transpose(logits, (0, 2, 1))                        # (B, C, S)
    mask = attention_mask[:, None, :].astype(logits.dtype)           # (B, 1, S)
    return logits * mask


if __name__ == "__main__":
    # Config-implied small hyperparameters:
    #   embedding_dim (BERT_INIT_EMBEDDING_DIM) = 32
    #   output_linear1_dim                      = 4
    #   max_sent_len (seq)                      = 8
    #   batch                                   = 2
    B, S, E, C = 2, 8, 32, 4

    key = jax.random.PRNGKey(0)
    k_rep, k_w, k_b = jax.random.split(key, 3)

    # Synthetic stand-in for the frozen BERT pooling-layer output.
    # TODO(synk): pretrained Japanese BERT encoder (checkpoint load) not reproducible here.
    rep_word = jax.random.normal(k_rep, (B, S, E), dtype=jnp.float32)

    # Attention mask: batch 0 fully attended, batch 1 has last 3 positions padded.
    attention_mask = jnp.stack(
        [jnp.ones((S,), jnp.float32),
         jnp.concatenate([jnp.ones((S - 3,), jnp.float32),
                          jnp.zeros((3,), jnp.float32)])],
        axis=0,
    )  # (B, S)

    # Deterministic linear1 parameters (PyTorch nn.Linear layout: weight (C, E), bias (C,)).
    bound = 1.0 / (E ** 0.5)
    weight = jax.random.uniform(k_w, (C, E), jnp.float32, -bound, bound)
    bias = jax.random.uniform(k_b, (C,), jnp.float32, -bound, bound)

    out = bio_ner_forward(rep_word, attention_mask, weight, bias)
    out = jax.block_until_ready(out)
    assert out.shape == (B, C, S), out.shape

    # All-f32 path now -> tight check against the f32 reference.
    ref = reference_forward(rep_word, attention_mask, weight, bias)
    assert jnp.allclose(out, ref, atol=1e-4, rtol=1e-4), \
        float(jnp.max(jnp.abs(out - ref)))

    # Second case: exercise the tiled + ragged-tail path (N = 150 not a
    # multiple of tile_n = 128) with an integer attention mask.
    B2, S2, E2 = 3, 50, 256
    k_rep2, k_w2, k_b2, k_m2 = jax.random.split(jax.random.PRNGKey(1), 4)
    rep_word2 = jax.random.normal(k_rep2, (B2, S2, E2), dtype=jnp.float32)
    attention_mask2 = (jax.random.uniform(k_m2, (B2, S2)) > 0.3).astype(jnp.int32)
    weight2 = jax.random.uniform(k_w2, (C, E2), jnp.float32, -0.05, 0.05)
    bias2 = jax.random.uniform(k_b2, (C,), jnp.float32, -0.05, 0.05)

    out2 = bio_ner_forward(rep_word2, attention_mask2, weight2, bias2, tile_n=128)
    out2 = jax.block_until_ready(out2)
    assert out2.shape == (B2, C, S2), out2.shape
    ref2 = reference_forward(rep_word2, attention_mask2, weight2, bias2)
    assert jnp.allclose(out2, ref2, atol=1e-4, rtol=1e-4), \
        float(jnp.max(jnp.abs(out2 - ref2)))

    print("KERNEL_OK")
</pallas_src>

<mosaic_0001>
module attributes {stable_mosaic.version = 11 : i64} {
  func.func @bio_ner_kernel(%arg0: i32, %arg1: memref<16x32xf32, #tpu.memory_space<vmem>>, %arg2: memref<1x16xf32, #tpu.memory_space<vmem>>, %arg3: memref<4x32xf32, #tpu.memory_space<vmem>>, %arg4: memref<4x1xf32, #tpu.memory_space<vmem>>, %arg5: memref<4x16xf32, #tpu.memory_space<vmem>>) attributes {dimension_semantics = [#tpu.dimension_semantics<parallel>], iteration_bounds = array<i64: 1>, scalar_prefetch = 0 : i64, scratch_operands = 0 : i64, tpu.core_type = #tpu.core_type<tc>, window_params = [{transform_indices = @transform_0, window_bounds = array<i64: 16, 32>}, {transform_indices = @transform_1, window_bounds = array<i64: 1, 16>}, {pipeline_mode = #tpu.pipeline_mode<synchronous>, transform_indices = @transform_2, window_bounds = array<i64: 4, 32>}, {pipeline_mode = #tpu.pipeline_mode<synchronous>, transform_indices = @transform_3, window_bounds = array<i64: 4, 1>}, {transform_indices = @transform_4, window_bounds = array<i64: 4, 16>}]} {
    %c0 = arith.constant 0 : index
    %c0_0 = arith.constant 0 : index
    %0 = vector.load %arg3[%c0, %c0_0] : memref<4x32xf32, #tpu.memory_space<vmem>>, vector<4x32xf32>
    %c0_1 = arith.constant 0 : index
    %c0_2 = arith.constant 0 : index
    %1 = vector.load %arg1[%c0_1, %c0_2] : memref<16x32xf32, #tpu.memory_space<vmem>>, vector<16x32xf32>
    %cst = arith.constant dense<0.000000e+00> : vector<4x16xf32>
    %2 = tpu.matmul %0, %1, %cst {dimension_numbers = #tpu.dot_dimension_numbers<[1], [1], [0], [0], [0, 0, 1, 0], [], []>} : vector<4x32xf32>, vector<16x32xf32>, vector<4x16xf32> -> vector<4x16xf32>
    %c0_3 = arith.constant 0 : index
    %c0_4 = arith.constant 0 : index
    %3 = vector.load %arg4[%c0_3, %c0_4] : memref<4x1xf32, #tpu.memory_space<vmem>>, vector<4x1xf32>
    %4 = vector.broadcast %3 : vector<4x1xf32> to vector<4x16xf32>
    %5 = arith.addf %2, %4 : vector<4x16xf32>
    %c0_5 = arith.constant 0 : index
    %c0_6 = arith.constant 0 : index
    %6 = vector.load %arg2[%c0_5, %c0_6] : memref<1x16xf32, #tpu.memory_space<vmem>>, vector<1x16xf32>
    %7 = vector.broadcast %6 : vector<1x16xf32> to vector<4x16xf32>
    %8 = arith.mulf %5, %7 : vector<4x16xf32>
    %c0_7 = arith.constant 0 : index
    %c0_8 = arith.constant 0 : index
    %9 = vector.load %arg5[%c0_7, %c0_8] : memref<4x16xf32, #tpu.memory_space<vmem>>, vector<4x16xf32>
    tpu.vector_store %arg5[%c0_7, %c0_8], %8 {strides = array<i32>} : memref<4x16xf32, #tpu.memory_space<vmem>>, vector<4x16xf32>,
    return
  }
  func.func @transform_0(%arg0: i32) -> (i32, i32) {
    %c0_i32 = arith.constant 0 : i32
    %c0_i32_0 = arith.constant 0 : i32
    return %arg0, %c0_i32 : i32, i32
  }
  func.func @transform_1(%arg0: i32) -> (i32, i32) {
    %c0_i32 = arith.constant 0 : i32
    %c0_i32_0 = arith.constant 0 : i32
    return %c0_i32, %arg0 : i32, i32
  }
  func.func @transform_2(%arg0: i32) -> (i32, i32) {
    %c0_i32 = arith.constant 0 : i32
    %c0_i32_0 = arith.constant 0 : i32
    %c0_i32_1 = arith.constant 0 : i32
    return %c0_i32, %c0_i32_0 : i32, i32
  }
  func.func @transform_3(%arg0: i32) -> (i32, i32) {
    %c0_i32 = arith.constant 0 : i32
    %c0_i32_0 = arith.constant 0 : i32
    %c0_i32_1 = arith.constant 0 : i32
    return %c0_i32, %c0_i32_0 : i32, i32
  }
  func.func @transform_4(%arg0: i32) -> (i32, i32) {
    %c0_i32 = arith.constant 0 : i32
    %c0_i32_0 = arith.constant 0 : i32
    return %c0_i32, %arg0 : i32, i32
  }
}

</mosaic_0001>

<bundles_post_ra>
// kernel: tpu_custom_call.1
= control target key start
LH: loop header
LB: loop body
LE: loop exit
PB: predicated region body
PF: predicated region fallthrough
CT: control target
= control target key end

     0   :  { %9 = vsyncpa [#allocation3], 0  ;;  %s259_s0 = inlined_call_operand.hbm [shape: f32[16,32], index: 0, kind: input, shape index: {}]   ;;  %s260_s1 = inlined_call_operand.vmem [shape: f32[1,16], index: 1, kind: input, shape index: {}]   ;;  %s261_s2 = inlined_call_operand.vmem [shape: f32[4,32], index: 2, kind: input, shape index: {}]   ;;  %s262_s3 = inlined_call_operand.vmem [shape: f32[4,1], index: 3, kind: input, shape index: {}]   ;;  %s263_s4 = inlined_call_operand.hbm [shape: f32[4,16], index: 4, kind: output, shape index: {}]  }
   0x1   :  { %10 = vsyncpa [#allocation4], 0  ;;  %s212_s15 = smov [#allocation2]  }
   0x2   :  { %s16_s16 = sshll.u32 %s212_s15, 4  ;;  %s17_s16 = int_to_ptr.vmem [resolvable:$true] %s16_s16 }
   0x3   :  { %s176_s17 = scalar_lea.vmem %s17_s16, 256  ;;  %p181_p1 = scmp.lt.s32.totalorder %s17_s16, %s17_s16 }
   0x4   :  { %p177_p0 = scmp.ne.s32.totalorder %s17_s16, %s176_s17  ;;  %p182_p2 = scmp.lt.s32.totalorder %s176_s17, %s176_s17 }
   0x6   :  { %p183_p3 = por %p182_p2, %p181_p1 }
   0x8   :  { %p184_p4 = pnand %p183_p3, %p177_p0 }
   0xa   :  { %187 = shalt.err (!%p184_p4)
}
   0xb   :  { %s213_s18 = smov 128   ;;  %s214_s19 = smov 8  }
   0xc   :  { %22 = dma.hbm_to_vmem [thread:$0]  %s259_s0, 256, %s17_s16, [#allocation3], %s213_s18, %s213_s18, %s214_s19  }
   0xd   :  { %208 = dma.done.wait [#allocation3], 256  }
   0xe   :  { %209 = vsyncadd [#allocation3], 4294967040  ;;  %v215_v0 = vmov 0.0   ;;  %vm216_vm0 = vmmov 0   ;;  %v217_v1 = vmov 0   ;;  %vm41_vm1 = vcmask 261120  }
   0xf   :  { %153 = vmatprep.subr.mxu0 %v215_v0  ;;  %157 = vmatprep.mubr.msk.f32.mxu0 %vm216_vm0, %v215_v0  ;;  %v34_v2 = vld [vmem:[#allocation2 + $0x8] sm:$0xff]  ;;  %v35_v3 = vld [vmem:[%s262_s3] sm:$0xf]  ;;  %s218_s27 = smov [#allocation5]   ;;  %vm129_vm2 = vcmask 125952  }
  0x10   :  { %167 = vset.pattern.permute.xlu0 %v217_v1  ;;  %154 = vmatpush3.xpose.msk.msra.mxu0 %vm41_vm1, %v34_v2  ;;  %v33_v4 = vld [vmem:[#allocation2] sm:$0xff]  ;;  %s137_s28 = sshll.u32 %s218_s27, 4  ;;  %s138_s28 = int_to_ptr.vmem [resolvable:$true] %s137_s28 }
  0x11   :  { %155 = vmatprep.subr.mxu0 %v215_v0  ;;  %38 = vperm.xlu0 %167, %v35_v3   ;;  %v32_v5 = vld [vmem:[%s261_s2] sm:$0xf]  ;;  %s188_s3 = scalar_lea.vmem %s138_s28, 64  ;;  %p193_p6 = scmp.lt.s32.totalorder %s138_s28, %s138_s28 }
  0x12   :  { %v149_v8 = vld [vmem:[%s260_s1] ss:$0 sm:$0xff]  ;;  %p189_p5 = scmp.ne.s32.totalorder %s138_s28, %s188_s3  ;;  %p194_p7 = scmp.lt.s32.totalorder %s188_s3, %s188_s3 }
  0x14   :  { %156 = vmatpush3.xpose.msk.msra.mxu0 %vm41_vm1, %v33_v4  ;;  %p195_p8 = por %p194_p7, %p193_p6 }
  0x16   :  { %p196_p9 = pnand %p195_p8, %p189_p5 }
  0x17   :  { %158 = vmatmul.mubr.msk.f32.vlgmr.msra.gmra.mxu0 %vm41_vm1, %v32_v5 }
  0x8c   :  { %v39_v6 = vpop.permute.xlu0 %38 }
  0xd7   :  { %v117_v7 = vpop.f32.mrf.mxu0 }
  0xd8   :  { %v118_v9 = vadd.f32 %v117_v7, %v39_v6 }
  0xd9   :  { %v159_v10 = vpop.f32.mrf.mxu0 }
  0xda   :  { %v128_v11 = vmul.f32 %v149_v8, %v118_v9 }
  0xdc   :  { %130 = vst.msk [vmem:[#allocation5] sm:$0xf] %vm129_vm2, %v128_v11 }
  0xdd   :  { %199 = shalt.err (!%p196_p9)
}
  0xde   :  { %140 = dma.vmem_to_hbm [thread:$0]  %s138_s28, 64, %s263_s4, [#allocation4]  }
  0xdf   :  { %210 = dma.done.wait [#allocation4], 64  }
  0xe0   :  { %211 = vsyncadd [#allocation4], 4294967232 }
  0xe1   :  { %144 = vsyncpa [#allocation3], 1 }
  0xe2   :  { %145 = vsyncpa [#allocation4], 1 }

</bundles_post_ra>
